<compile_context>
chip_gen: v6e
topology: v6e:2x2x1
jax: 0.10.0
libtpu: 0.0.40
codegen_flags: <defaults>
</compile_context>

<pallas_src>
import jax
import jax.numpy as jnp
from jax.experimental import pallas as pl
from jax.experimental.pallas import tpu as pltpu


def _round_up(x, m):
    return (x + m - 1) // m * m


# ----------------------------------------------------------------------------- kernel
def icm_kernel(eta_ref, phi_s_ref, phi_ns_ref, a_ref,
               w1s_ref, w1ns_ref, w1oh_ref, b1_ref, w2_ref, b2_ref, out_ref):
    # phi_s, phi_ns : (bb, F) f32      a : (bb, 1) int32
    # w1s/w1ns      : (F, 2H) bf16     w1oh : (A, 2H) bf16     b1 : (1, 2H) f32
    # w2            : (2H, OW) bf16    b2   : (1, OW) f32      out : (bb, OW) f32
    bb = phi_s_ref.shape[0]
    f_dim = phi_ns_ref.shape[1]
    a_dim = w1oh_ref.shape[0]
    af = a_dim + f_dim

    phi_s = phi_s_ref[...]
    phi_ns = phi_ns_ref[...]

    # in-kernel one-hot (no HBM materialization of a B×A float array)
    one_hot = (jax.lax.broadcasted_iota(jnp.int32, (bb, a_dim), 1)
               == a_ref[...]).astype(jnp.bfloat16)

    # fused first layer: h = [h_inv | h_fwd]; bf16 MXU matmuls, f32 accumulation
    h = (jnp.dot(phi_s.astype(jnp.bfloat16), w1s_ref[...],
                 preferred_element_type=jnp.float32)
         + jnp.dot(phi_ns.astype(jnp.bfloat16), w1ns_ref[...],
                   preferred_element_type=jnp.float32)
         + jnp.dot(one_hot, w1oh_ref[...],
                   preferred_element_type=jnp.float32)
         + b1_ref[...])
    h = jnp.maximum(h, 0.0)                                    # (bb, 2H)

    # fused, lane-padded second layer: cols = [pred_next_phi | pred_action | 0-pad]
    y = (jnp.dot(h.astype(jnp.bfloat16), w2_ref[...],
                 preferred_element_type=jnp.float32)
         + b2_ref[...])                                        # (bb, OW)

    # intrinsic reward: pred_next_phi sits at lanes [0, F) (lane-0-aligned slice)
    diff = y[:, :f_dim] - phi_ns
    reward = eta_ref[0] * jnp.sum(diff * diff, axis=1, keepdims=True)      # (bb, 1)

    # drop reward into column A+F, then ONE unmasked full-tile store
    col = jax.lax.broadcasted_iota(jnp.int32, y.shape, 1)
    out_ref[...] = jnp.where(col == af, reward, y)


# ----------------------------------------------------------------------------- wrapper
def icm_forward(params, phi_state, phi_next_state, action, *, eta=0.1, block_b=None):
    """Pallas equivalent of ICMModel.forward.

    Returns (pred_next_phi, pred_action, phi_next_state, intrinsic_reward)."""
    B, f_dim = phi_state.shape
    a_dim = params["action_dim"]
    h_dim = params["hidden_size"]
    h2 = 2 * h_dim
    af = a_dim + f_dim
    out_w = params["w2"].shape[1]          # lane-padded packed head width (multiple of 128)

    # batch tile: large tiles (amortize ~0.35us/step overhead), but >= 2 grid steps
    # when the batch allows it so v7x's two TensorCores both get work.
    b8 = _round_up(max(B, 8), 8)
    if block_b is None:
        cap = 4096                          # ~3 MB/step working set -> fits v5e scoped VMEM
        steps = max(2, pl.cdiv(b8, cap)) if b8 > 8 else 1
        block_b = _round_up(pl.cdiv(b8, steps), 8)
    else:
        block_b = _round_up(max(block_b, 8), 8)
    b_pad = _round_up(b8, block_b)

    a_col = action.astype(jnp.int32).reshape(B, 1)
    pad = b_pad - B
    if pad:
        phi_s_p = jnp.pad(phi_state, ((0, pad), (0, 0)))
        phi_ns_p = jnp.pad(phi_next_state, ((0, pad), (0, 0)))
        a_col = jnp.pad(a_col, ((0, pad), (0, 0)))
    else:
        phi_s_p, phi_ns_p = phi_state, phi_next_state

    eta_arr = jnp.full((1,), eta, jnp.float32)
    grid = (b_pad // block_b,)

    d1 = 2 * f_dim + a_dim
    flops = 2 * b_pad * (d1 * h2 + h2 * out_w) + 4 * b_pad * (h2 + out_w + f_dim)
    bytes_accessed = (phi_s_p.size * 4 + phi_ns_p.size * 4 + a_col.size * 4
                      + params["w1_s"].size * 2 + params["w1_ns"].size * 2
                      + params["w1_oh"].size * 2 + params["b1"].size * 4
                      + params["w2"].size * 2 + params["b2"].size * 4
                      + b_pad * out_w * 4)

    packed = pl.pallas_call(
        icm_kernel,
        out_shape=jax.ShapeDtypeStruct((b_pad, out_w), jnp.float32),
        grid=grid,
        in_specs=[
            pl.BlockSpec(memory_space=pltpu.MemorySpace.SMEM),           # eta scalar
            pl.BlockSpec((block_b, f_dim), lambda i: (i, 0)),            # phi_state
            pl.BlockSpec((block_b, f_dim), lambda i: (i, 0)),            # phi_next_state
            pl.BlockSpec((block_b, 1), lambda i: (i, 0)),                # action column
            pl.BlockSpec((f_dim, h2), lambda i: (0, 0)),                 # W1 (phi_s rows)
            pl.BlockSpec((f_dim, h2), lambda i: (0, 0)),                 # W1 (phi_ns rows)
            pl.BlockSpec((a_dim, h2), lambda i: (0, 0)),                 # W1 (one-hot rows)
            pl.BlockSpec((1, h2), lambda i: (0, 0)),                     # b1
            pl.BlockSpec((h2, out_w), lambda i: (0, 0)),                 # W2 (lane-padded)
            pl.BlockSpec((1, out_w), lambda i: (0, 0)),                  # b2 (lane-padded)
        ],
        out_specs=pl.BlockSpec((block_b, out_w), lambda i: (i, 0)),
        compiler_params=pltpu.CompilerParams(dimension_semantics=("parallel",)),
        cost_estimate=pl.CostEstimate(flops=flops, transcendentals=0,
                                      bytes_accessed=bytes_accessed),
    )(eta_arr, phi_s_p, phi_ns_p, a_col,
      params["w1_s"], params["w1_ns"], params["w1_oh"], params["b1"],
      params["w2"], params["b2"])

    packed = packed[:B]
    pred_next_phi = packed[:, :f_dim]
    pred_action = packed[:, f_dim:af]
    intrinsic_reward = packed[:, af]
    return pred_next_phi, pred_action, phi_next_state, intrinsic_reward


# ----------------------------------------------------------------------------- params
def init_params(key, feature_dim, action_dim, hidden_size):
    """Synthetic PyTorch-style params, packed once into block-structured bf16 weights.

    First layer (split by input block, columns = [h_inv | h_fwd]):
      w1_s  (F, 2H) = [w_i1[:F]   | w_f1[:F] ]
      w1_ns (F, 2H) = [w_i1[F:2F] |    0     ]
      w1_oh (A, 2H) = [    0      | w_f1[F:] ]
    Second layer (lane-padded to a multiple of 128, cols = [pred_next_phi | pred_action | 0]):
      w2 (2H, OW), b2 (1, OW)
    """
    f_, a_, h_ = feature_dim, action_dim, hidden_size
    ks = jax.random.split(key, 4)

    def lin(k, fan_in, fan_out):
        bound = 1.0 / jnp.sqrt(fan_in)
        kw, kb = jax.random.split(k)
        w = jax.random.uniform(kw, (fan_in, fan_out), jnp.float32, -bound, bound)
        b = jax.random.uniform(kb, (1, fan_out), jnp.float32, -bound, bound)
        return w, b

    w_i1, b_i1 = lin(ks[0], 2 * f_, h_)          # inverse_model layer 1: Linear(2F, H)
    w_i2, b_i2 = lin(ks[1], h_, a_)              # inverse_model layer 2: Linear(H, A)
    w_f1, b_f1 = lin(ks[2], f_ + a_, h_)         # forward_model layer 1: Linear(F+A, H)
    w_f2, b_f2 = lin(ks[3], h_, f_)              # forward_model layer 2: Linear(H, F)

    h2 = 2 * h_
    out_w = _round_up(a_ + f_ + 1, 128)          # packed [pred_next_phi|pred_action|reward|pad]

    w1_s = jnp.concatenate([w_i1[:f_], w_f1[:f_]], axis=1)
    w1_ns = jnp.concatenate([w_i1[f_:], jnp.zeros((f_, h_), jnp.float32)], axis=1)
    w1_oh = jnp.concatenate([jnp.zeros((a_, h_), jnp.float32), w_f1[f_:]], axis=1)
    b1 = jnp.concatenate([b_i1, b_f1], axis=1)   # (1, 2H)

    w2 = jnp.zeros((h2, out_w), jnp.float32)
    w2 = w2.at[h_:, :f_].set(w_f2)               # h_fwd -> pred_next_phi (lanes [0, F))
    w2 = w2.at[:h_, f_:f_ + a_].set(w_i2)        # h_inv -> pred_action  (lanes [F, F+A))
    b2 = jnp.zeros((1, out_w), jnp.float32)
    b2 = b2.at[:, :f_].set(b_f2)
    b2 = b2.at[:, f_:f_ + a_].set(b_i2)

    return dict(w1_s=w1_s.astype(jnp.bfloat16), w1_ns=w1_ns.astype(jnp.bfloat16),
                w1_oh=w1_oh.astype(jnp.bfloat16), b1=b1,
                w2=w2.astype(jnp.bfloat16), b2=b2,
                feature_dim=f_, action_dim=a_, hidden_size=h_)


# ----------------------------------------------------------------------------- reference
def reference_forward(params, phi_state, phi_next_state, action, *, eta=0.1):
    """Pure-JAX reference mirroring the PyTorch module (same bf16 weights/activations)."""
    f_, a_, h_ = params["feature_dim"], params["action_dim"], params["hidden_size"]
    bf = jnp.bfloat16

    w1_s, w1_ns, w1_oh = params["w1_s"], params["w1_ns"], params["w1_oh"]
    w_i1 = jnp.concatenate([w1_s[:, :h_], w1_ns[:, :h_]], axis=0)        # (2F, H)
    w_f1 = jnp.concatenate([w1_s[:, h_:], w1_oh[:, h_:]], axis=0)        # (F+A, H)
    b_i1, b_f1 = params["b1"][:, :h_], params["b1"][:, h_:]
    w_i2 = params["w2"][:h_, f_:f_ + a_]
    w_f2 = params["w2"][h_:, :f_]
    b_i2 = params["b2"][:, f_:f_ + a_]
    b_f2 = params["b2"][:, :f_]

    def mm(x, w):
        return jnp.dot(x.astype(bf), w, preferred_element_type=jnp.float32)

    inverse_input = jnp.concatenate([phi_state, phi_next_state], axis=1)
    pred_action = mm(jax.nn.relu(mm(inverse_input, w_i1) + b_i1), w_i2) + b_i2

    one_hot = jax.nn.one_hot(action, a_, dtype=jnp.float32)
    forward_input = jnp.concatenate([phi_state, one_hot], axis=1)
    pred_next_phi = mm(jax.nn.relu(mm(forward_input, w_f1) + b_f1), w_f2) + b_f2

    reward = eta * jnp.sum((pred_next_phi - phi_next_state) ** 2, axis=1)
    return pred_next_phi, pred_action, phi_next_state, reward


# ----------------------------------------------------------------------------- main
if __name__ == "__main__":
    feature_dim, action_dim, hidden_size, eta = 32, 8, 32, 0.1

    key = jax.random.PRNGKey(0)
    k_par, k1, k2, k3, k4, k5, k6 = jax.random.split(key, 7)
    params = init_params(k_par, feature_dim, action_dim, hidden_size)

    def check(batch, block_b, keys):
        ks_, kns_, ka_ = keys
        phi_state = jax.random.normal(ks_, (batch, feature_dim), jnp.float32)
        phi_next_state = jax.random.normal(kns_, (batch, feature_dim), jnp.float32)
        action = jax.random.randint(ka_, (batch,), 0, action_dim, jnp.int32)

        outs = jax.block_until_ready(
            icm_forward(params, phi_state, phi_next_state, action,
                        eta=eta, block_b=block_b))
        refs = reference_forward(params, phi_state, phi_next_state, action, eta=eta)
        names = ("pred_next_phi", "pred_action", "phi_next_state", "intrinsic_reward")
        for n, o, r in zip(names, outs, refs):
            assert o.shape == r.shape, f"{n}: shape {o.shape} vs {r.shape}"
            assert jnp.allclose(o, r, atol=1e-3, rtol=1e-3), f"{n} mismatch vs reference"

    # small single-block case
    check(8, None, (k1, k2, k3))
    # gridded + batch-padded case (exercises the parallel batch grid and padding path)
    check(200, 64, (k4, k5, k6))

    print("KERNEL_OK")
</pallas_src>

<mosaic_0001>
module attributes {stable_mosaic.version = 11 : i64} {
  func.func @icm_kernel(%arg0: i32, %arg1: memref<1xf32, #tpu.memory_space<smem>>, %arg2: memref<8x32xf32, #tpu.memory_space<vmem>>, %arg3: memref<8x32xf32, #tpu.memory_space<vmem>>, %arg4: memref<8x1xi32, #tpu.memory_space<vmem>>, %arg5: memref<32x64xbf16, #tpu.memory_space<vmem>>, %arg6: memref<32x64xbf16, #tpu.memory_space<vmem>>, %arg7: memref<8x64xbf16, #tpu.memory_space<vmem>>, %arg8: memref<1x64xf32, #tpu.memory_space<vmem>>, %arg9: memref<64x128xbf16, #tpu.memory_space<vmem>>, %arg10: memref<1x128xf32, #tpu.memory_space<vmem>>, %arg11: memref<8x128xf32, #tpu.memory_space<vmem>>) attributes {dimension_semantics = [#tpu.dimension_semantics<parallel>], iteration_bounds = array<i64: 1>, scalar_prefetch = 0 : i64, scratch_operands = 0 : i64, tpu.core_type = #tpu.core_type<tc>, window_params = [{transform_indices = @transform_0, window_bounds = array<i64: 1>}, {transform_indices = @transform_1, window_bounds = array<i64: 8, 32>}, {transform_indices = @transform_2, window_bounds = array<i64: 8, 32>}, {transform_indices = @transform_3, window_bounds = array<i64: 8, 1>}, {pipeline_mode = #tpu.pipeline_mode<synchronous>, transform_indices = @transform_4, window_bounds = array<i64: 32, 64>}, {pipeline_mode = #tpu.pipeline_mode<synchronous>, transform_indices = @transform_5, window_bounds = array<i64: 32, 64>}, {pipeline_mode = #tpu.pipeline_mode<synchronous>, transform_indices = @transform_6, window_bounds = array<i64: 8, 64>}, {pipeline_mode = #tpu.pipeline_mode<synchronous>, transform_indices = @transform_7, window_bounds = array<i64: 1, 64>}, {pipeline_mode = #tpu.pipeline_mode<synchronous>, transform_indices = @transform_8, window_bounds = array<i64: 64, 128>}, {pipeline_mode = #tpu.pipeline_mode<synchronous>, transform_indices = @transform_9, window_bounds = array<i64: 1, 128>}, {transform_indices = @transform_10, window_bounds = array<i64: 8, 128>}]} {
    %c0 = arith.constant 0 : index
    %c0_0 = arith.constant 0 : index
    %0 = vector.load %arg2[%c0, %c0_0] : memref<8x32xf32, #tpu.memory_space<vmem>>, vector<8x32xf32>
    %c0_1 = arith.constant 0 : index
    %c0_2 = arith.constant 0 : index
    %1 = vector.load %arg3[%c0_1, %c0_2] : memref<8x32xf32, #tpu.memory_space<vmem>>, vector<8x32xf32>
    %2 = tpu.iota {dimensions = array<i32: 1>} : vector<8x8xi32>
    %c0_3 = arith.constant 0 : index
    %c0_4 = arith.constant 0 : index
    %3 = vector.load %arg4[%c0_3, %c0_4] : memref<8x1xi32, #tpu.memory_space<vmem>>, vector<8x1xi32>
    %4 = vector.broadcast %3 : vector<8x1xi32> to vector<8x8xi32>
    %5 = arith.cmpi eq, %2, %4 : vector<8x8xi32>
    %6 = arith.extui %5 : vector<8x8xi1> to vector<8x8xi32>
    %7 = arith.sitofp %6 : vector<8x8xi32> to vector<8x8xf32>
    %8 = arith.truncf %7 : vector<8x8xf32> to vector<8x8xbf16>
    %9 = arith.truncf %0 : vector<8x32xf32> to vector<8x32xbf16>
    %c0_5 = arith.constant 0 : index
    %c0_6 = arith.constant 0 : index
    %10 = vector.load %arg5[%c0_5, %c0_6] : memref<32x64xbf16, #tpu.memory_space<vmem>>, vector<32x64xbf16>
    %cst = arith.constant dense<0.000000e+00> : vector<8x64xf32>
    %11 = tpu.matmul %9, %10, %cst {dimension_numbers = #tpu.dot_dimension_numbers<[1], [0], [0], [1], [0, 0, 1, 1], [], []>} : vector<8x32xbf16>, vector<32x64xbf16>, vector<8x64xf32> -> vector<8x64xf32>
    %12 = arith.truncf %1 : vector<8x32xf32> to vector<8x32xbf16>
    %c0_7 = arith.constant 0 : index
    %c0_8 = arith.constant 0 : index
    %13 = vector.load %arg6[%c0_7, %c0_8] : memref<32x64xbf16, #tpu.memory_space<vmem>>, vector<32x64xbf16>
    %cst_9 = arith.constant dense<0.000000e+00> : vector<8x64xf32>
    %14 = tpu.matmul %12, %13, %cst_9 {dimension_numbers = #tpu.dot_dimension_numbers<[1], [0], [0], [1], [0, 0, 1, 1], [], []>} : vector<8x32xbf16>, vector<32x64xbf16>, vector<8x64xf32> -> vector<8x64xf32>
    %15 = arith.addf %11, %14 : vector<8x64xf32>
    %c0_10 = arith.constant 0 : index
    %c0_11 = arith.constant 0 : index
    %16 = vector.load %arg7[%c0_10, %c0_11] : memref<8x64xbf16, #tpu.memory_space<vmem>>, vector<8x64xbf16>
    %cst_12 = arith.constant dense<0.000000e+00> : vector<8x64xf32>
    %17 = tpu.matmul %8, %16, %cst_12 {dimension_numbers = #tpu.dot_dimension_numbers<[1], [0], [0], [1], [0, 0, 1, 1], [], []>} : vector<8x8xbf16>, vector<8x64xbf16>, vector<8x64xf32> -> vector<8x64xf32>
    %18 = arith.addf %15, %17 : vector<8x64xf32>
    %c0_13 = arith.constant 0 : index
    %c0_14 = arith.constant 0 : index
    %19 = vector.load %arg8[%c0_13, %c0_14] : memref<1x64xf32, #tpu.memory_space<vmem>>, vector<1x64xf32>
    %20 = vector.broadcast %19 : vector<1x64xf32> to vector<8x64xf32>
    %21 = arith.addf %18, %20 : vector<8x64xf32>
    %cst_15 = arith.constant 0.000000e+00 : f32
    %22 = vector.broadcast %cst_15 : f32 to vector<8x64xf32>
    %23 = arith.maximumf %21, %22 : vector<8x64xf32>
    %24 = arith.truncf %23 : vector<8x64xf32> to vector<8x64xbf16>
    %c0_16 = arith.constant 0 : index
    %c0_17 = arith.constant 0 : index
    %25 = vector.load %arg9[%c0_16, %c0_17] : memref<64x128xbf16, #tpu.memory_space<vmem>>, vector<64x128xbf16>
    %cst_18 = arith.constant dense<0.000000e+00> : vector<8x128xf32>
    %26 = tpu.matmul %24, %25, %cst_18 {dimension_numbers = #tpu.dot_dimension_numbers<[1], [0], [0], [1], [0, 0, 1, 1], [], []>} : vector<8x64xbf16>, vector<64x128xbf16>, vector<8x128xf32> -> vector<8x128xf32>
    %c0_19 = arith.constant 0 : index
    %c0_20 = arith.constant 0 : index
    %27 = vector.load %arg10[%c0_19, %c0_20] : memref<1x128xf32, #tpu.memory_space<vmem>>, vector<1x128xf32>
    %28 = vector.broadcast %27 : vector<1x128xf32> to vector<8x128xf32>
    %29 = arith.addf %26, %28 : vector<8x128xf32>
    %30 = vector.extract_strided_slice %29 {offsets = [0, 0], sizes = [8, 32], strides = [1, 1]} : vector<8x128xf32> to vector<8x32xf32>
    %31 = arith.subf %30, %1 : vector<8x32xf32>
    %c0_21 = arith.constant 0 : index
    %32 = memref.load %arg1[%c0_21] : memref<1xf32, #tpu.memory_space<smem>>
    %33 = arith.mulf %31, %31 : vector<8x32xf32>
    %cst_22 = arith.constant dense<0.000000e+00> : vector<8xf32>
    %34 = vector.multi_reduction <add>, %33, %cst_22 [1] : vector<8x32xf32> to vector<8xf32>
    %35 = vector.shape_cast %34 : vector<8xf32> to vector<8x1xf32>
    %36 = vector.broadcast %32 : f32 to vector<8x1xf32>
    %37 = arith.mulf %36, %35 : vector<8x1xf32>
    %38 = tpu.iota {dimensions = array<i32: 1>} : vector<8x128xi32>
    %c40_i32 = arith.constant 40 : i32
    %39 = vector.broadcast %c40_i32 : i32 to vector<8x128xi32>
    %40 = arith.cmpi eq, %38, %39 : vector<8x128xi32>
    %41 = vector.shape_cast %37 : vector<8x1xf32> to vector<8x1xf32>
    %42 = vector.broadcast %41 : vector<8x1xf32> to vector<8x128xf32>
    %43 = arith.select %40, %42, %29 : vector<8x128xi1>, vector<8x128xf32>
    %c0_23 = arith.constant 0 : index
    %c0_24 = arith.constant 0 : index
    %44 = vector.load %arg11[%c0_23, %c0_24] : memref<8x128xf32, #tpu.memory_space<vmem>>, vector<8x128xf32>
    tpu.vector_store %arg11[%c0_23, %c0_24], %43 {strides = array<i32>} : memref<8x128xf32, #tpu.memory_space<vmem>>, vector<8x128xf32>,
    return
  }
  func.func @transform_0(%arg0: i32) -> i32 {
    %c0_i32 = arith.constant 0 : i32
    %c0_i32_0 = arith.constant 0 : i32
    return %c0_i32 : i32
  }
  func.func @transform_1(%arg0: i32) -> (i32, i32) {
    %c0_i32 = arith.constant 0 : i32
    %c0_i32_0 = arith.constant 0 : i32
    return %arg0, %c0_i32 : i32, i32
  }
  func.func @transform_2(%arg0: i32) -> (i32, i32) {
    %c0_i32 = arith.constant 0 : i32
    %c0_i32_0 = arith.constant 0 : i32
    return %arg0, %c0_i32 : i32, i32
  }
  func.func @transform_3(%arg0: i32) -> (i32, i32) {
    %c0_i32 = arith.constant 0 : i32
    %c0_i32_0 = arith.constant 0 : i32
    return %arg0, %c0_i32 : i32, i32
  }
  func.func @transform_4(%arg0: i32) -> (i32, i32) {
    %c0_i32 = arith.constant 0 : i32
    %c0_i32_0 = arith.constant 0 : i32
    %c0_i32_1 = arith.constant 0 : i32
    return %c0_i32, %c0_i32_0 : i32, i32
  }
  func.func @transform_5(%arg0: i32) -> (i32, i32) {
    %c0_i32 = arith.constant 0 : i32
    %c0_i32_0 = arith.constant 0 : i32
    %c0_i32_1 = arith.constant 0 : i32
    return %c0_i32, %c0_i32_0 : i32, i32
  }
  func.func @transform_6(%arg0: i32) -> (i32, i32) {
    %c0_i32 = arith.constant 0 : i32
    %c0_i32_0 = arith.constant 0 : i32
    %c0_i32_1 = arith.constant 0 : i32
    return %c0_i32, %c0_i32_0 : i32, i32
  }
  func.func @transform_7(%arg0: i32) -> (i32, i32) {
    %c0_i32 = arith.constant 0 : i32
    %c0_i32_0 = arith.constant 0 : i32
    %c0_i32_1 = arith.constant 0 : i32
    return %c0_i32, %c0_i32_0 : i32, i32
  }
  func.func @transform_8(%arg0: i32) -> (i32, i32) {
    %c0_i32 = arith.constant 0 : i32
    %c0_i32_0 = arith.constant 0 : i32
    %c0_i32_1 = arith.constant 0 : i32
    return %c0_i32, %c0_i32_0 : i32, i32
  }
  func.func @transform_9(%arg0: i32) -> (i32, i32) {
    %c0_i32 = arith.constant 0 : i32
    %c0_i32_0 = arith.constant 0 : i32
    %c0_i32_1 = arith.constant 0 : i32
    return %c0_i32, %c0_i32_0 : i32, i32
  }
  func.func @transform_10(%arg0: i32) -> (i32, i32) {
    %c0_i32 = arith.constant 0 : i32
    %c0_i32_0 = arith.constant 0 : i32
    return %arg0, %c0_i32 : i32, i32
  }
}

</mosaic_0001>

<bundles_post_ra>
// kernel: tpu_custom_call.1
= control target key start
LH: loop header
LB: loop body
LE: loop exit
PB: predicated region body
PF: predicated region fallthrough
CT: control target
= control target key end

     0   :  { %16 = vsyncpa [#allocation4], 0  ;;  %s695_s0 = inlined_call_operand.<no memory space> [shape: f32[1], index: 0, kind: input, shape index: {}]   ;;  %s696_s1 = inlined_call_operand.hbm [shape: f32[8,32], index: 1, kind: input, shape index: {}]   ;;  %s697_s2 = inlined_call_operand.hbm [shape: f32[8,32], index: 2, kind: input, shape index: {}]   ;;  %s698_s3 = inlined_call_operand.vmem [shape: s32[8,1], index: 3, kind: input, shape index: {}]   ;;  %s699_s4 = inlined_call_operand.vmem [shape: bf16[32,64], index: 4, kind: input, shape index: {}]   ;;  %s700_s5 = inlined_call_operand.hbm [shape: bf16[32,64], index: 5, kind: input, shape index: {}]   ;;  %s701_s6 = inlined_call_operand.vmem [shape: bf16[8,64], index: 6, kind: input, shape index: {}]   ;;  %s702_s7 = inlined_call_operand.vmem [shape: f32[1,64], index: 7, kind: input, shape index: {}]   ;;  %s703_s8 = inlined_call_operand.hbm [shape: bf16[64,128], index: 8, kind: input, shape index: {}]   ;;  %s704_s9 = inlined_call_operand.vmem [shape: f32[1,128], index: 9, kind: input, shape index: {}]   ;;  %s705_s10 = inlined_call_operand.hbm [shape: f32[8,128], index: 10, kind: output, shape index: {}]  }
   0x1   :  { %17 = vsyncpa [#allocation7], 0 }
   0x2   :  { %18 = vsyncpa [#allocation10], 0 }
   0x3   :  { %19 = vsyncpa [#allocation5], 0  ;;  %s582_s13 = smov [#allocation6]   ;;  %s583_s15 = smov [#allocation3]  }
   0x4   :  { %s38_s14 = sshll.u32 %s582_s13, 4  ;;  %s28_s16 = sshll.u32 %s583_s15, 4  ;;  %s39_s14 = int_to_ptr.vmem [resolvable:$true] %s38_s14  ;;  %s29_s16 = int_to_ptr.vmem [resolvable:$true] %s28_s16 }
   0x5   :  { %s482_s17 = scalar_lea.vmem %s39_s14, 128  ;;  %p487_p1 = scmp.lt.s32.totalorder %s39_s14, %s39_s14 }
   0x6   :  { %p483_p0 = scmp.ne.s32.totalorder %s39_s14, %s482_s17  ;;  %p488_p2 = scmp.lt.s32.totalorder %s482_s17, %s482_s17 }
   0x8   :  { %p489_p3 = por %p488_p2, %p487_p1 }
   0xa   :  { %p490_p4 = pnand %p489_p3, %p483_p0 }
   0xc   :  { %493 = shalt.err (!%p490_p4)
}
   0xd   :  { %41 = dma.hbm_to_vmem [thread:$0]  %s697_s2, 128, %s39_s14, [#allocation7]  }
   0xe   :  { %s502_s20 = scalar_lea.vmem %s29_s16, 128  ;;  %p507_p6 = scmp.lt.s32.totalorder %s29_s16, %s29_s16 }
   0xf   :  { %p503_p5 = scmp.ne.s32.totalorder %s29_s16, %s502_s20  ;;  %p508_p7 = scmp.lt.s32.totalorder %s502_s20, %s502_s20 }
  0x11   :  { %p509_p8 = por %p508_p7, %p507_p6 }
  0x13   :  { %p510_p9 = pnand %p509_p8, %p503_p5 }
  0x15   :  { %513 = shalt.err (!%p510_p9)
}
  0x16   :  { %31 = dma.hbm_to_vmem [thread:$0]  %s696_s1, 128, %s29_s16, [#allocation4]  }
  0x17   :  { %s584_s23 = smov [#allocation8]  }
  0x18   :  { %s51_s24 = sshll.u32 %s584_s23, 4  ;;  %s52_s24 = int_to_ptr.vmem [resolvable:$true] %s51_s24 }
  0x19   :  { %s522_s25 = scalar_lea.vmem %s52_s24, 256  ;;  %p527_p11 = scmp.lt.s32.totalorder %s52_s24, %s52_s24 }
  0x1a   :  { %p523_p10 = scmp.ne.s32.totalorder %s52_s24, %s522_s25  ;;  %p528_p12 = scmp.lt.s32.totalorder %s522_s25, %s522_s25 }
  0x1c   :  { %p529_p13 = por %p528_p12, %p527_p11 }
  0x1e   :  { %p530_p0 = pnand %p529_p13, %p523_p10 }
  0x20   :  { %533 = shalt.err (!%p530_p0)
}
  0x21   :  { %s585_s2 = smov 64   ;;  %s586_s26 = smov 4  }
  0x22   :  { %57 = dma.hbm_to_vmem [thread:$0]  %s700_s5, 256, %s52_s24, [#allocation7], %s585_s2, %s585_s2, %s586_s26  }
  0x23   :  { %s587_s29 = smov [#allocation9]  }
  0x24   :  { %s67_s30 = sshll.u32 %s587_s29, 4  ;;  %s68_s30 = int_to_ptr.vmem [resolvable:$true] %s67_s30 }
  0x25   :  { %s542_s1 = scalar_lea.vmem %s68_s30, 512  ;;  %p547_p2 = scmp.lt.s32.totalorder %s68_s30, %s68_s30 }
  0x26   :  { %p543_p1 = scmp.ne.s32.totalorder %s68_s30, %s542_s1  ;;  %p548_p3 = scmp.lt.s32.totalorder %s542_s1, %s542_s1 }
  0x28   :  { %p549_p4 = por %p548_p3, %p547_p2 }
  0x2a   :  { %p550_p5 = pnand %p549_p4, %p543_p1 }
  0x2c   :  { %553 = shalt.err (!%p550_p5)
}
  0x2d   :  { %73 = dma.hbm_to_vmem [thread:$0]  %s703_s8, 512, %s68_s30, [#allocation10], %s585_s2, %s585_s2, %s586_s26  }
  0x2e   :  { %574 = dma.done.wait [#allocation4], 128  }
  0x2f   :  { %575 = vsyncadd [#allocation4], 4294967168 }
  0x30   :  { %576 = dma.done.wait [#allocation7], 384  }
  0x31   :  { %577 = vsyncadd [#allocation7], 4294966912 }
  0x32   :  { %578 = dma.done.wait [#allocation10], 512  }
  0x33   :  { %579 = vsyncadd [#allocation10], 4294966784  ;;  %v588_v0 = vmov 0   ;;  %v589_v1 = vmov 0.0   ;;  %vm590_vm0 = vmmov 0   ;;  %v93_v2 = vld [vmem:[%s698_s3] sm:$0xff]  ;;  %v91_v15 = vlaneseq }
  0x34   :  { %465 = vset.pattern.permute.xlu0 %v588_v0  ;;  %421 = vmatprep.subr.bf16.mxu0 %v589_v1  ;;  %v466_v3 = vld [vmem:[#allocation8 + $0x8] sm:$0xff]   ;;  %v467_v4 = vld [vmem:[#allocation8] sm:$0xff]   ;;  %v468_v5 = vld [vmem:[%s699_s4 + $0x8] sm:$0xff]   ;;  %vm227_vm1 = vcmask 1043456   ;;  %vm123_vm2 = vcmask 261120   ;;  %vm223_vm4 = vcmask 64512   ;;  %v371_v49 = vstv %s695_s0 }
  0x35   :  { %429 = vmatprep.subr.bf16.mxu1 %v589_v1  ;;  %425 = vmatprep.mubr.msk.bf16.mxu0 %vm590_vm0, %v589_v1  ;;  %v667_v6 = vld [vmem:[#allocation6] sm:$0xff]  ;;  %v469_v7 = vld [vmem:[%s699_s4] sm:$0xff]   ;;  %v470_v13 = vld [vmem:[#allocation9 + $0x18] sm:$0xff]   ;;  %v92_v16 = vand.u32 127, %v91_v15  ;;  %vm321_vm5 = vcmask 523264   ;;  %s591_s21 = smov [#allocation11]  }
  0x36   :  { %433 = vmatprep.mubr.msk.bf16.mxu1 %vm590_vm0, %v589_v1  ;;  %95 = vperm.xlu0 %465, %v93_v2   ;;  %v89_v8 = vld [vmem:[#allocation3] sm:$0xff]  ;;  %v106_v10 = vpack.c.bf16 %v667_v6, %v667_v6  ;;  %v471_v14 = vld [vmem:[#allocation9 + $0x10] sm:$0xff]   ;;  %v472_v20 = vld [vmem:[#allocation9 + $0x8] sm:$0xff]   ;;  %s382_s22 = sshll.u32 %s591_s21, 4  ;;  %s383_s22 = int_to_ptr.vmem [resolvable:$true] %s382_s22 }
  0x37   :  { %422 = vmatpush3.bf16.msra.mxu0 %v466_v3  ;;  %430 = vmatpush3.bf16.msra.mxu1 %v468_v5  ;;  %v222_v9 = vld [vmem:[%s701_s6] sm:$0xf]  ;;  %v101_v11 = vpack.c.bf16 %v89_v8, %v89_v8  ;;  %vm373_vm6 = vcmp.eq.s32.totalorder %v92_v16, 40  ;;  %p559_p7 = scmp.lt.s32.totalorder %s383_s22, %s383_s22 }
  0x38   :  { %423 = vmatprep.subr.bf16.mxu0 %v589_v1  ;;  %431 = vmatprep.subr.bf16.mxu1 %v589_v1  ;;  %v229_v12 = vsel %vm227_vm1, %v222_v9, 0  ;;  %v473_v21 = vld [vmem:[#allocation9] sm:$0xff]  }
  0x39   :  { %v401_v32 = vld [vmem:[%s702_s7] ss:$0 sm:$0xff] }
  0x3a   :  { %v402_v40 = vld [vmem:[%s704_s9] ss:$0 sm:$0xff]  ;;  %s554_s9 = scalar_lea.vmem %s383_s22, 128 }
  0x3b   :  { %424 = vmatpush3.bf16.msra.mxu0 %v467_v4  ;;  %432 = vmatpush3.bf16.msra.mxu1 %v469_v7  ;;  %p555_p6 = scmp.ne.s32.totalorder %s383_s22, %s554_s9  ;;  %p560_p8 = scmp.lt.s32.totalorder %s554_s9, %s554_s9 }
  0x3c   :  { %437 = vmatprep.subr.bf16.mxu0 %v589_v1  ;;  %443 = vmatprep.subr.bf16.mxu1 %v589_v1 }
  0x3d   :  { %p561_p9 = por %p560_p8, %p559_p7 }
  0x3e   :  { %426 = vmatmul.mubr.msk.bf16.vlgmr.msra.gmra.mxu0 %vm123_vm2, %v106_v10  ;;  %434 = vmatmul.mubr.msk.bf16.vlgmr.msra.gmra.mxu1 %vm123_vm2, %v101_v11 }
  0x3f   :  { %438 = vmatpush3.bf16.msra.mxu0 %v229_v12  ;;  %439 = vmatprep.mubr.msk.bf16.mxu0 %vm590_vm0, %v589_v1  ;;  %p562_p10 = pnand %p561_p9, %p555_p6 }
  0x40   :  { %451 = vmatprep.mubr.msk.bf16.mxu1 %vm590_vm0, %v589_v1  ;;  %444 = vmatpush3.bf16.msra.mxu1 %v470_v13 }
  0x41   :  { %445 = vmatprep.subr.bf16.mxu1 %v589_v1 }
  0x44   :  { %446 = vmatpush3.bf16.msra.mxu1 %v471_v14 }
  0x45   :  { %447 = vmatprep.subr.bf16.mxu1 %v589_v1 }
  0x48   :  { %448 = vmatpush3.bf16.msra.mxu1 %v472_v20 }
  0x49   :  { %449 = vmatprep.subr.bf16.mxu1 %v589_v1 }
  0x4c   :  { %450 = vmatpush3.bf16.msra.mxu1 %v473_v21 }
  0xb1   :  { %v96_v17 = vpop.permute.xlu0 %95 }
  0xb2   :  { %vm97_vm3 = vcmp.eq.s32.totalorder %v92_v16, %v96_v17 }
  0xb3   :  { %v393_v18 = vsel %vm97_vm3, 1.0, %v589_v1 }
  0xb4   :  { %v100_v19 = vpack.c.bf16 %v393_v18, %v393_v18 }
  0xb6   :  { %440 = vmatmul.mubr.msk.bf16.vlgmr.msra.gmra.mxu0 %vm223_vm4, %v100_v19 }
  0xfe   :  { %v161_v22 = vpop.f32.mrf.mxu0  ;;  %v216_v24 = vpop.f32.mrf.mxu1 }
  0xff   :  { %v217_v25 = vadd.f32 %v216_v24, %v161_v22 }
 0x100   :  { %v427_v23 = vpop.f32.mrf.mxu0  ;;  %v435_v27 = vpop.f32.mrf.mxu1 }
 0x102   :  { %v164_v26 = vpop.f32.mrf.mxu0  ;;  %v219_v29 = vpop.f32.mrf.mxu1 }
 0x104   :  { %v428_v28 = vpop.f32.mrf.mxu0  ;;  %v436_v30 = vpop.f32.mrf.mxu1 }
 0x176   :  { %v265_v31 = vpop.f32.mrf.mxu0 }
 0x177   :  { %v271_v33 = vadd.f32 %v265_v31, %v217_v25 }
 0x178   :  { %v441_v34 = vpop.f32.mrf.mxu0 }
 0x179   :  { %v279_v35 = vadd.f32 %v401_v32, %v271_v33 }
 0x17a   :  { %v268_v36 = vpop.f32.mrf.mxu0 }
 0x17b   :  { %v280_v37 = vmax.f32 %v279_v35, 0.0 }
 0x17c   :  { %v442_v38 = vpop.f32.mrf.mxu0 }
 0x17d   :  { %v281_v39 = vpack.c.bf16 %v280_v37, %v280_v37 }
 0x17f   :  { %452 = vmatmul.mubr.msk.bf16.vlgmr.msra.gmra.mxu1 %vm321_vm5, %v281_v39 }
 0x23f   :  { %v359_v41 = vpop.f32.mrf.mxu1 }
 0x240   :  { %v360_v42 = vadd.f32 %v402_v40, %v359_v41 }
 0x241   :  { %v453_v43 = vpop.f32.mrf.mxu1 }
 0x242   :  { %v365_v44 = vsub.f32 %v360_v42, %v667_v6 }
 0x243   :  { %v362_v45 = vpop.f32.mrf.mxu1 }
 0x244   :  { %v367_v46 = vmul.f32 %v365_v44, %v365_v44 }
 0x245   :  { %v454_v47 = vpop.f32.mrf.mxu1 }
 0x246   :  { %v368_v48 = vsel %vm123_vm2, %v367_v46, 0.0 }
 0x247   :  { %369 = vadd.xlane.f32.xlu0 %v368_v48 }
 0x2d0   :  { %v370_v50 = vpop.xlane.xlu0 %369 }
 0x2d1   :  { %v372_v51 = vmul.f32 %v371_v49, %v370_v50 }
 0x2d3   :  { %v374_v52 = vsel %vm373_vm6, %v372_v51, %v360_v42 }
 0x2d4   :  { %375 = vst [vmem:[#allocation11] sm:$0xff] %v374_v52 }
 0x2d5   :  { %565 = shalt.err (!%p562_p10)
}
 0x2d6   :  { %385 = dma.vmem_to_hbm [thread:$0]  %s383_s22, 128, %s705_s10, [#allocation5]  }
 0x2d7   :  { %580 = dma.done.wait [#allocation5], 128  }
 0x2d8   :  { %581 = vsyncadd [#allocation5], 4294967168 }
 0x2d9   :  { %389 = vsyncpa [#allocation4], 1 }
 0x2da   :  { %390 = vsyncpa [#allocation7], 1 }
 0x2db   :  { %391 = vsyncpa [#allocation10], 1 }
 0x2dc   :  { %392 = vsyncpa [#allocation5], 1 }

</bundles_post_ra>
